<compile_context>
chip_gen: v6e
topology: v6e:2x2x1
jax: 0.10.0
libtpu: 0.0.40
codegen_flags: <defaults>
</compile_context>

<pallas_src>
import functools

import numpy as np
import jax
import jax.numpy as jnp
from jax import lax
from jax.experimental import pallas as pl
from jax.experimental.pallas import tpu as pltpu

EPS = 1e-5  # PyTorch InstanceNorm2d default


def _instance_norm(h):
    """One-pass InstanceNorm over the spatial (lane) axis of a (C, HW) f32 tile."""
    inv_n = 1.0 / h.shape[1]
    mean = jnp.sum(h, axis=1, keepdims=True) * inv_n
    ex2 = jnp.sum(h * h, axis=1, keepdims=True) * inv_n
    var = jnp.maximum(ex2 - mean * mean, 0.0)
    return (h - mean) * lax.rsqrt(var + EPS)


def _tap_metadata(H, W):
    """Static roll shifts + (9, H*W) f32 boundary masks for the 3x3 'same' conv."""
    HW = H * W
    col = np.arange(HW) % W
    row = np.arange(HW) // W
    shifts, masks = [], []
    for ky in range(3):
        for kx in range(3):
            dy, dx = ky - 1, kx - 1
            # shifted[i] = a[i + dy*W + dx]  (jnp.roll convention)
            shifts.append(((-(dy * W + dx)) % HW, not (dy == 0 and dx == 0)))
            masks.append((row + dy >= 0) & (row + dy < H)
                         & (col + dx >= 0) & (col + dx < W))
    return np.stack(masks).astype(np.float32), tuple(shifts)


def resblocks_kernel(x_ref, m_ref, w1_ref, b1_ref, w2_ref, b2_ref, w3_ref, b3_ref,
                     o_ref, act_ref, *, tap_shifts, compute_dtype):
    # Grid: (image n [parallel], bottleneck block k [arbitrary]).
    # x_ref/o_ref : (1, C, HW)      m_ref : (9, HW) f32 boundary masks
    # w1 : (1, M, C)   w2 : (1, 9, M, M) (tap-major; each tap a clean (M, M) tile)
    # w3 : (1, C, M)   b* : (1, *, 1)    act_ref : (C, HW) f32 VMEM scratch
    k = pl.program_id(1)
    cdt = compute_dtype

    @pl.when(k == 0)
    def _():                                    # seed the residual stream for this image
        act_ref[...] = x_ref[0].astype(jnp.float32)

    h = act_ref[...]                            # (C, HW) f32 residual stream

    # -- Conv2d(dim, m_dim, 1) + InstanceNorm + ReLU --------------------------------
    a = jnp.dot(w1_ref[0], h.astype(cdt),
                preferred_element_type=jnp.float32) + b1_ref[0]         # (M, HW)
    a = jnp.maximum(_instance_norm(a), 0.0)

    # -- Conv2d(m_dim, m_dim, 3, pad=1): nine accumulated per-tap matmuls -----------
    # pltpu.roll (XLU) + boundary-mask multiply (VPU) build each shifted tap; only one
    # tap is live at a time (no materialized (9M, HW) im2col, no concatenate relayout).
    b = None
    for t, (shift, needs_mask) in enumerate(tap_shifts):
        tap = a if shift == 0 else pltpu.roll(a, shift=shift, axis=1)
        if needs_mask:
            tap = tap * m_ref[pl.ds(t, 1), :]   # zero wrapped / out-of-image lanes
        p = jnp.dot(w2_ref[0, t], tap.astype(cdt),
                    preferred_element_type=jnp.float32)                 # (M, HW)
        b = p if b is None else b + p
    b = jnp.maximum(_instance_norm(b + b2_ref[0]), 0.0)

    # -- Conv2d(m_dim, dim, 1) + InstanceNorm (no ReLU) + residual ------------------
    r = jnp.dot(w3_ref[0], b.astype(cdt),
                preferred_element_type=jnp.float32) + b3_ref[0]         # (C, HW)
    h = h + _instance_norm(r)
    act_ref[...] = h

    @pl.when(k == pl.num_programs(1) - 1)
    def _():                                    # single lane-dense writeback per image
        o_ref[0] = h.astype(o_ref.dtype)


def resblocks_pallas(x_nchw, params, *, compute_dtype=jnp.bfloat16):
    """Equivalent of ResBlocks.forward. Input NCHW (PyTorch convention)."""
    w1, b1, w2, b2, w3, b3 = params
    N, C, H, W = x_nchw.shape
    nb, M = w1.shape[0], w1.shape[1]
    HW = H * W

    x2 = x_nchw.reshape(N, C, HW)               # NCHW already has spatial last
    # (blk, out, ky, kx, in) -> (blk, tap=ky*3+kx, out, in): one MXU tile per tap.
    w2t = jnp.transpose(w2, (0, 2, 3, 1, 4)).reshape(nb, 9, M, M)

    # MXU operands in compute_dtype (bf16 on v5e/v6e/v7x); biases / norms stay f32.
    w1c = w1.astype(compute_dtype)
    w2c = w2t.astype(compute_dtype)
    w3c = w3.astype(compute_dtype)

    mask_np, tap_shifts = _tap_metadata(H, W)
    masks = jnp.asarray(mask_np)                # (9, HW) f32, trace-time constant

    kernel = functools.partial(resblocks_kernel,
                               tap_shifts=tap_shifts, compute_dtype=compute_dtype)

    out = pl.pallas_call(
        kernel,
        out_shape=jax.ShapeDtypeStruct((N, C, HW), x_nchw.dtype),
        grid=(N, nb),
        in_specs=[
            pl.BlockSpec((1, C, HW), lambda n, k: (n, 0, 0)),       # x (read at k==0)
            pl.BlockSpec((9, HW), lambda n, k: (0, 0)),             # boundary masks
            pl.BlockSpec((1, M, C), lambda n, k: (k, 0, 0)),        # w1[k] (streamed)
            pl.BlockSpec((1, M, 1), lambda n, k: (k, 0, 0)),        # b1[k]
            pl.BlockSpec((1, 9, M, M), lambda n, k: (k, 0, 0, 0)),  # w2[k]
            pl.BlockSpec((1, M, 1), lambda n, k: (k, 0, 0)),        # b2[k]
            pl.BlockSpec((1, C, M), lambda n, k: (k, 0, 0)),        # w3[k]
            pl.BlockSpec((1, C, 1), lambda n, k: (k, 0, 0)),        # b3[k]
        ],
        out_specs=pl.BlockSpec((1, C, HW), lambda n, k: (n, 0, 0)),
        scratch_shapes=[pltpu.VMEM((C, HW), jnp.float32)],          # residual stream
        input_output_aliases={0: 0},            # output overwrites the activation buffer
        compiler_params=pltpu.CompilerParams(
            dimension_semantics=("parallel", "arbitrary"),
            vmem_limit_bytes=32 * 1024 * 1024),
    )(x2, masks, w1c, b1, w2c, b2, w3c, b3)
    return out.reshape(N, C, H, W)


def init_resblocks_params(key, dim, m_dim, num_blocks):
    """Deterministic synthetic weights, stacked per block and pre-transposed for the
    (Cout, Cin) @ (Cin, HW) form.  3x3 conv weight layout: (blk, out, ky, kx, in)."""
    ks = jax.random.split(key, 6)
    w1 = 0.1 * jax.random.normal(ks[0], (num_blocks, m_dim, dim), jnp.float32)
    b1 = 0.1 * jax.random.normal(ks[1], (num_blocks, m_dim, 1), jnp.float32)
    w2 = 0.1 * jax.random.normal(ks[2], (num_blocks, m_dim, 3, 3, m_dim), jnp.float32)
    b2 = 0.1 * jax.random.normal(ks[3], (num_blocks, m_dim, 1), jnp.float32)
    w3 = 0.1 * jax.random.normal(ks[4], (num_blocks, dim, m_dim), jnp.float32)
    b3 = 0.1 * jax.random.normal(ks[5], (num_blocks, dim, 1), jnp.float32)
    return (w1, b1, w2, b2, w3, b3)


def resblocks_ref(x, params):
    """Pure-JAX f32 reference of the PyTorch ResBlocks forward (correctness check)."""
    w1, b1, w2, b2, w3, b3 = params
    num_blocks = w1.shape[0]

    def inorm(h):  # (N, C, H, W)
        mean = jnp.mean(h, axis=(2, 3), keepdims=True)
        var = jnp.mean((h - mean) ** 2, axis=(2, 3), keepdims=True)
        return (h - mean) * lax.rsqrt(var + EPS)

    out = x
    for k in range(num_blocks):
        h = jnp.einsum('oc,nchw->nohw', w1[k], out,
                       precision=lax.Precision.HIGHEST) + b1[k][None, :, :, None]
        h = jnp.maximum(inorm(h), 0.0)
        wk = jnp.transpose(w2[k], (0, 3, 1, 2))          # (out, ky, kx, in) -> OIHW
        h = lax.conv_general_dilated(
            h, wk, window_strides=(1, 1), padding=((1, 1), (1, 1)),
            dimension_numbers=('NCHW', 'OIHW', 'NCHW'),
            precision=lax.Precision.HIGHEST) + b2[k][None, :, :, None]
        h = jnp.maximum(inorm(h), 0.0)
        r = jnp.einsum('oc,nchw->nohw', w3[k], h,
                       precision=lax.Precision.HIGHEST) + b3[k][None, :, :, None]
        out = out + inorm(r)
    return out


if __name__ == "__main__":
    dim, m_dim, num_blocks = 4, 8, 2
    N, H, W = 2, 16, 16

    key = jax.random.PRNGKey(0)
    kx, kp = jax.random.split(key)
    x = jax.random.normal(kx, (N, dim, H, W), jnp.float32)   # NCHW, like PyTorch
    params = init_resblocks_params(kp, dim, m_dim, num_blocks)

    ref = resblocks_ref(x, params)

    # Exact-semantics path (f32 MXU operands): tight check vs the f32 reference.
    out_f32 = jax.jit(functools.partial(resblocks_pallas,
                                        compute_dtype=jnp.float32))(x, params)
    jax.block_until_ready(out_f32)
    assert out_f32.shape == (N, dim, H, W)
    err_f32 = float(jnp.max(jnp.abs(out_f32 - ref)))
    assert err_f32 < 1e-3, f"f32 path: max abs error vs reference = {err_f32}"

    # Production path (bf16 MXU operands, f32 accumulation / InstanceNorm).
    # Loose bound: bf16 operand rounding compounds through 6 InstanceNorms, but any
    # structural bug (wrong tap/mask/weight layout) would produce O(1) errors.
    out_bf16 = jax.jit(resblocks_pallas)(x, params)
    jax.block_until_ready(out_bf16)
    assert out_bf16.shape == (N, dim, H, W)
    err_bf16 = float(jnp.max(jnp.abs(out_bf16 - ref)))
    assert err_bf16 < 2.5e-1, f"bf16 path: max abs error vs reference = {err_bf16}"

    print("KERNEL_OK")
</pallas_src>

<mosaic_0001>
module attributes {stable_mosaic.version = 11 : i64} {
  func.func @resblocks_kernel(%arg0: i32, %arg1: i32, %arg2: memref<1x4x256xf32, #tpu.memory_space<vmem>>, %arg3: memref<9x256xf32, #tpu.memory_space<vmem>>, %arg4: memref<1x8x4xf32, #tpu.memory_space<vmem>>, %arg5: memref<1x8x1xf32, #tpu.memory_space<vmem>>, %arg6: memref<1x9x8x8xf32, #tpu.memory_space<vmem>>, %arg7: memref<1x8x1xf32, #tpu.memory_space<vmem>>, %arg8: memref<1x4x8xf32, #tpu.memory_space<vmem>>, %arg9: memref<1x4x1xf32, #tpu.memory_space<vmem>>, %arg10: memref<1x4x256xf32, #tpu.memory_space<vmem>>, %arg11: memref<4x256xf32, #tpu.memory_space<vmem>>) attributes {dimension_semantics = [#tpu.dimension_semantics<parallel>, #tpu.dimension_semantics<arbitrary>], iteration_bounds = array<i64: 2, 2>, scalar_prefetch = 0 : i64, scratch_operands = 1 : i64, tpu.core_type = #tpu.core_type<tc>, window_params = [{transform_indices = @transform_0, window_bounds = array<i64: 1, 4, 256>}, {pipeline_mode = #tpu.pipeline_mode<synchronous>, transform_indices = @transform_1, window_bounds = array<i64: 9, 256>}, {transform_indices = @transform_2, window_bounds = array<i64: 1, 8, 4>}, {transform_indices = @transform_3, window_bounds = array<i64: 1, 8, 1>}, {transform_indices = @transform_4, window_bounds = array<i64: 1, 9, 8, 8>}, {transform_indices = @transform_5, window_bounds = array<i64: 1, 8, 1>}, {transform_indices = @transform_6, window_bounds = array<i64: 1, 4, 8>}, {transform_indices = @transform_7, window_bounds = array<i64: 1, 4, 1>}, {transform_indices = @transform_8, window_bounds = array<i64: 1, 4, 256>}]} {
    %c0_i32 = arith.constant 0 : i32
    %0 = arith.cmpi eq, %arg1, %c0_i32 : i32
    %1 = arith.extui %0 : i1 to i32
    %c0_i32_0 = arith.constant 0 : i32
    %2 = arith.cmpi ne, %1, %c0_i32_0 : i32
    scf.if %2 {
      %c0_95 = arith.constant 0 : index
      %c0_96 = arith.constant 0 : index
      %c0_97 = arith.constant 0 : index
      %158 = vector.load %arg2[%c0_95, %c0_96, %c0_97] : memref<1x4x256xf32, #tpu.memory_space<vmem>>, vector<1x4x256xf32>
      %159 = vector.shape_cast %158 : vector<1x4x256xf32> to vector<4x256xf32>
      %c0_98 = arith.constant 0 : index
      %c0_99 = arith.constant 0 : index
      %160 = vector.load %arg11[%c0_98, %c0_99] : memref<4x256xf32, #tpu.memory_space<vmem>>, vector<4x256xf32>
      tpu.vector_store %arg11[%c0_98, %c0_99], %159 {strides = array<i32>} : memref<4x256xf32, #tpu.memory_space<vmem>>, vector<4x256xf32>,
    } else {
    }
    %c0 = arith.constant 0 : index
    %c0_1 = arith.constant 0 : index
    %3 = vector.load %arg11[%c0, %c0_1] : memref<4x256xf32, #tpu.memory_space<vmem>>, vector<4x256xf32>
    %c0_2 = arith.constant 0 : index
    %c0_3 = arith.constant 0 : index
    %c0_4 = arith.constant 0 : index
    %4 = vector.load %arg4[%c0_2, %c0_3, %c0_4] : memref<1x8x4xf32, #tpu.memory_space<vmem>>, vector<1x8x4xf32>
    %5 = vector.shape_cast %4 : vector<1x8x4xf32> to vector<8x4xf32>
    %cst = arith.constant dense<0.000000e+00> : vector<8x256xf32>
    %6 = tpu.matmul %5, %3, %cst {dimension_numbers = #tpu.dot_dimension_numbers<[1], [0], [0], [1], [0, 0, 1, 1], [], []>} : vector<8x4xf32>, vector<4x256xf32>, vector<8x256xf32> -> vector<8x256xf32>
    %c0_5 = arith.constant 0 : index
    %c0_6 = arith.constant 0 : index
    %c0_7 = arith.constant 0 : index
    %7 = vector.load %arg5[%c0_5, %c0_6, %c0_7] : memref<1x8x1xf32, #tpu.memory_space<vmem>>, vector<1x8x1xf32>
    %8 = vector.shape_cast %7 : vector<1x8x1xf32> to vector<8x1xf32>
    %9 = vector.broadcast %8 : vector<8x1xf32> to vector<8x256xf32>
    %10 = arith.addf %6, %9 : vector<8x256xf32>
    %cst_8 = arith.constant dense<0.000000e+00> : vector<8xf32>
    %11 = vector.multi_reduction <add>, %10, %cst_8 [1] : vector<8x256xf32> to vector<8xf32>
    %12 = vector.shape_cast %11 : vector<8xf32> to vector<8x1xf32>
    %cst_9 = arith.constant 3.906250e-03 : f32
    %13 = vector.broadcast %cst_9 : f32 to vector<8x1xf32>
    %14 = arith.mulf %12, %13 : vector<8x1xf32>
    %15 = arith.mulf %10, %10 : vector<8x256xf32>
    %cst_10 = arith.constant dense<0.000000e+00> : vector<8xf32>
    %16 = vector.multi_reduction <add>, %15, %cst_10 [1] : vector<8x256xf32> to vector<8xf32>
    %17 = vector.shape_cast %16 : vector<8xf32> to vector<8x1xf32>
    %cst_11 = arith.constant 3.906250e-03 : f32
    %18 = vector.broadcast %cst_11 : f32 to vector<8x1xf32>
    %19 = arith.mulf %17, %18 : vector<8x1xf32>
    %20 = arith.mulf %14, %14 : vector<8x1xf32>
    %21 = arith.subf %19, %20 : vector<8x1xf32>
    %cst_12 = arith.constant 0.000000e+00 : f32
    %22 = vector.broadcast %cst_12 : f32 to vector<8x1xf32>
    %23 = arith.maximumf %21, %22 : vector<8x1xf32>
    %24 = vector.broadcast %14 : vector<8x1xf32> to vector<8x256xf32>
    %25 = arith.subf %10, %24 : vector<8x256xf32>
    %cst_13 = arith.constant 9.99999974E-6 : f32
    %26 = vector.broadcast %cst_13 : f32 to vector<8x1xf32>
    %27 = arith.addf %23, %26 : vector<8x1xf32>
    %28 = math.rsqrt %27 : vector<8x1xf32>
    %29 = vector.broadcast %28 : vector<8x1xf32> to vector<8x256xf32>
    %30 = arith.mulf %25, %29 : vector<8x256xf32>
    %cst_14 = arith.constant 0.000000e+00 : f32
    %31 = vector.broadcast %cst_14 : f32 to vector<8x256xf32>
    %32 = arith.maximumf %30, %31 : vector<8x256xf32>
    %c17_i32 = arith.constant 17 : i32
    %33 = tpu.dynamic_rotate %32 by %c17_i32 dim 1 : vector<8x256xf32>, i32 -> vector<8x256xf32>
    %c0_15 = arith.constant 0 : index
    %c0_16 = arith.constant 0 : index
    %34 = vector.load %arg3[%c0_15, %c0_16] : memref<9x256xf32, #tpu.memory_space<vmem>>, vector<1x256xf32>
    %35 = vector.broadcast %34 : vector<1x256xf32> to vector<8x256xf32>
    %36 = arith.mulf %33, %35 : vector<8x256xf32>
    %c0_17 = arith.constant 0 : index
    %c0_18 = arith.constant 0 : index
    %c0_19 = arith.constant 0 : index
    %c0_20 = arith.constant 0 : index
    %37 = vector.load %arg6[%c0_17, %c0_18, %c0_19, %c0_20] : memref<1x9x8x8xf32, #tpu.memory_space<vmem>>, vector<1x1x8x8xf32>
    %38 = vector.shape_cast %37 : vector<1x1x8x8xf32> to vector<8x8xf32>
    %cst_21 = arith.constant dense<0.000000e+00> : vector<8x256xf32>
    %39 = tpu.matmul %38, %36, %cst_21 {dimension_numbers = #tpu.dot_dimension_numbers<[1], [0], [0], [1], [0, 0, 1, 1], [], []>} : vector<8x8xf32>, vector<8x256xf32>, vector<8x256xf32> -> vector<8x256xf32>
    %c16_i32 = arith.constant 16 : i32
    %40 = tpu.dynamic_rotate %32 by %c16_i32 dim 1 : vector<8x256xf32>, i32 -> vector<8x256xf32>
    %c1 = arith.constant 1 : index
    %c0_22 = arith.constant 0 : index
    %41 = vector.load %arg3[%c1, %c0_22] : memref<9x256xf32, #tpu.memory_space<vmem>>, vector<1x256xf32>
    %42 = vector.broadcast %41 : vector<1x256xf32> to vector<8x256xf32>
    %43 = arith.mulf %40, %42 : vector<8x256xf32>
    %c0_23 = arith.constant 0 : index
    %c1_24 = arith.constant 1 : index
    %c0_25 = arith.constant 0 : index
    %c0_26 = arith.constant 0 : index
    %44 = vector.load %arg6[%c0_23, %c1_24, %c0_25, %c0_26] : memref<1x9x8x8xf32, #tpu.memory_space<vmem>>, vector<1x1x8x8xf32>
    %45 = vector.shape_cast %44 : vector<1x1x8x8xf32> to vector<8x8xf32>
    %cst_27 = arith.constant dense<0.000000e+00> : vector<8x256xf32>
    %46 = tpu.matmul %45, %43, %cst_27 {dimension_numbers = #tpu.dot_dimension_numbers<[1], [0], [0], [1], [0, 0, 1, 1], [], []>} : vector<8x8xf32>, vector<8x256xf32>, vector<8x256xf32> -> vector<8x256xf32>
    %47 = arith.addf %39, %46 : vector<8x256xf32>
    %c15_i32 = arith.constant 15 : i32
    %48 = tpu.dynamic_rotate %32 by %c15_i32 dim 1 : vector<8x256xf32>, i32 -> vector<8x256xf32>
    %c2 = arith.constant 2 : index
    %c0_28 = arith.constant 0 : index
    %49 = vector.load %arg3[%c2, %c0_28] : memref<9x256xf32, #tpu.memory_space<vmem>>, vector<1x256xf32>
    %50 = vector.broadcast %49 : vector<1x256xf32> to vector<8x256xf32>
    %51 = arith.mulf %48, %50 : vector<8x256xf32>
    %c0_29 = arith.constant 0 : index
    %c2_30 = arith.constant 2 : index
    %c0_31 = arith.constant 0 : index
    %c0_32 = arith.constant 0 : index
    %52 = vector.load %arg6[%c0_29, %c2_30, %c0_31, %c0_32] : memref<1x9x8x8xf32, #tpu.memory_space<vmem>>, vector<1x1x8x8xf32>
    %53 = vector.shape_cast %52 : vector<1x1x8x8xf32> to vector<8x8xf32>
    %cst_33 = arith.constant dense<0.000000e+00> : vector<8x256xf32>
    %54 = tpu.matmul %53, %51, %cst_33 {dimension_numbers = #tpu.dot_dimension_numbers<[1], [0], [0], [1], [0, 0, 1, 1], [], []>} : vector<8x8xf32>, vector<8x256xf32>, vector<8x256xf32> -> vector<8x256xf32>
    %55 = arith.addf %47, %54 : vector<8x256xf32>
    %c1_i32 = arith.constant 1 : i32
    %56 = tpu.dynamic_rotate %32 by %c1_i32 dim 1 : vector<8x256xf32>, i32 -> vector<8x256xf32>
    %c3 = arith.constant 3 : index
    %c0_34 = arith.constant 0 : index
    %57 = vector.load %arg3[%c3, %c0_34] : memref<9x256xf32, #tpu.memory_space<vmem>>, vector<1x256xf32>
    %58 = vector.broadcast %57 : vector<1x256xf32> to vector<8x256xf32>
    %59 = arith.mulf %56, %58 : vector<8x256xf32>
    %c0_35 = arith.constant 0 : index
    %c3_36 = arith.constant 3 : index
    %c0_37 = arith.constant 0 : index
    %c0_38 = arith.constant 0 : index
    %60 = vector.load %arg6[%c0_35, %c3_36, %c0_37, %c0_38] : memref<1x9x8x8xf32, #tpu.memory_space<vmem>>, vector<1x1x8x8xf32>
    %61 = vector.shape_cast %60 : vector<1x1x8x8xf32> to vector<8x8xf32>
    %cst_39 = arith.constant dense<0.000000e+00> : vector<8x256xf32>
    %62 = tpu.matmul %61, %59, %cst_39 {dimension_numbers = #tpu.dot_dimension_numbers<[1], [0], [0], [1], [0, 0, 1, 1], [], []>} : vector<8x8xf32>, vector<8x256xf32>, vector<8x256xf32> -> vector<8x256xf32>
    %63 = arith.addf %55, %62 : vector<8x256xf32>
    %c0_40 = arith.constant 0 : index
    %c4 = arith.constant 4 : index
    %c0_41 = arith.constant 0 : index
    %c0_42 = arith.constant 0 : index
    %64 = vector.load %arg6[%c0_40, %c4, %c0_41, %c0_42] : memref<1x9x8x8xf32, #tpu.memory_space<vmem>>, vector<1x1x8x8xf32>
    %65 = vector.shape_cast %64 : vector<1x1x8x8xf32> to vector<8x8xf32>
    %cst_43 = arith.constant dense<0.000000e+00> : vector<8x256xf32>
    %66 = tpu.matmul %65, %32, %cst_43 {dimension_numbers = #tpu.dot_dimension_numbers<[1], [0], [0], [1], [0, 0, 1, 1], [], []>} : vector<8x8xf32>, vector<8x256xf32>, vector<8x256xf32> -> vector<8x256xf32>
    %67 = arith.addf %63, %66 : vector<8x256xf32>
    %c255_i32 = arith.constant 255 : i32
    %68 = tpu.dynamic_rotate %32 by %c255_i32 dim 1 : vector<8x256xf32>, i32 -> vector<8x256xf32>
    %c5 = arith.constant 5 : index
    %c0_44 = arith.constant 0 : index
    %69 = vector.load %arg3[%c5, %c0_44] : memref<9x256xf32, #tpu.memory_space<vmem>>, vector<1x256xf32>
    %70 = vector.broadcast %69 : vector<1x256xf32> to vector<8x256xf32>
    %71 = arith.mulf %68, %70 : vector<8x256xf32>
    %c0_45 = arith.constant 0 : index
    %c5_46 = arith.constant 5 : index
    %c0_47 = arith.constant 0 : index
    %c0_48 = arith.constant 0 : index
    %72 = vector.load %arg6[%c0_45, %c5_46, %c0_47, %c0_48] : memref<1x9x8x8xf32, #tpu.memory_space<vmem>>, vector<1x1x8x8xf32>
    %73 = vector.shape_cast %72 : vector<1x1x8x8xf32> to vector<8x8xf32>
    %cst_49 = arith.constant dense<0.000000e+00> : vector<8x256xf32>
    %74 = tpu.matmul %73, %71, %cst_49 {dimension_numbers = #tpu.dot_dimension_numbers<[1], [0], [0], [1], [0, 0, 1, 1], [], []>} : vector<8x8xf32>, vector<8x256xf32>, vector<8x256xf32> -> vector<8x256xf32>
    %75 = arith.addf %67, %74 : vector<8x256xf32>
    %c241_i32 = arith.constant 241 : i32
    %76 = tpu.dynamic_rotate %32 by %c241_i32 dim 1 : vector<8x256xf32>, i32 -> vector<8x256xf32>
    %c6 = arith.constant 6 : index
    %c0_50 = arith.constant 0 : index
    %77 = vector.load %arg3[%c6, %c0_50] : memref<9x256xf32, #tpu.memory_space<vmem>>, vector<1x256xf32>
    %78 = vector.broadcast %77 : vector<1x256xf32> to vector<8x256xf32>
    %79 = arith.mulf %76, %78 : vector<8x256xf32>
    %c0_51 = arith.constant 0 : index
    %c6_52 = arith.constant 6 : index
    %c0_53 = arith.constant 0 : index
    %c0_54 = arith.constant 0 : index
    %80 = vector.load %arg6[%c0_51, %c6_52, %c0_53, %c0_54] : memref<1x9x8x8xf32, #tpu.memory_space<vmem>>, vector<1x1x8x8xf32>
    %81 = vector.shape_cast %80 : vector<1x1x8x8xf32> to vector<8x8xf32>
    %cst_55 = arith.constant dense<0.000000e+00> : vector<8x256xf32>
    %82 = tpu.matmul %81, %79, %cst_55 {dimension_numbers = #tpu.dot_dimension_numbers<[1], [0], [0], [1], [0, 0, 1, 1], [], []>} : vector<8x8xf32>, vector<8x256xf32>, vector<8x256xf32> -> vector<8x256xf32>
    %83 = arith.addf %75, %82 : vector<8x256xf32>
    %c240_i32 = arith.constant 240 : i32
    %84 = tpu.dynamic_rotate %32 by %c240_i32 dim 1 : vector<8x256xf32>, i32 -> vector<8x256xf32>
    %c7 = arith.constant 7 : index
    %c0_56 = arith.constant 0 : index
    %85 = vector.load %arg3[%c7, %c0_56] : memref<9x256xf32, #tpu.memory_space<vmem>>, vector<1x256xf32>
    %86 = vector.broadcast %85 : vector<1x256xf32> to vector<8x256xf32>
    %87 = arith.mulf %84, %86 : vector<8x256xf32>
    %c0_57 = arith.constant 0 : index
    %c7_58 = arith.constant 7 : index
    %c0_59 = arith.constant 0 : index
    %c0_60 = arith.constant 0 : index
    %88 = vector.load %arg6[%c0_57, %c7_58, %c0_59, %c0_60] : memref<1x9x8x8xf32, #tpu.memory_space<vmem>>, vector<1x1x8x8xf32>
    %89 = vector.shape_cast %88 : vector<1x1x8x8xf32> to vector<8x8xf32>
    %cst_61 = arith.constant dense<0.000000e+00> : vector<8x256xf32>
    %90 = tpu.matmul %89, %87, %cst_61 {dimension_numbers = #tpu.dot_dimension_numbers<[1], [0], [0], [1], [0, 0, 1, 1], [], []>} : vector<8x8xf32>, vector<8x256xf32>, vector<8x256xf32> -> vector<8x256xf32>
    %91 = arith.addf %83, %90 : vector<8x256xf32>
    %c239_i32 = arith.constant 239 : i32
    %92 = tpu.dynamic_rotate %32 by %c239_i32 dim 1 : vector<8x256xf32>, i32 -> vector<8x256xf32>
    %c8 = arith.constant 8 : index
    %c0_62 = arith.constant 0 : index
    %93 = vector.load %arg3[%c8, %c0_62] : memref<9x256xf32, #tpu.memory_space<vmem>>, vector<1x256xf32>
    %94 = vector.broadcast %93 : vector<1x256xf32> to vector<8x256xf32>
    %95 = arith.mulf %92, %94 : vector<8x256xf32>
    %c0_63 = arith.constant 0 : index
    %c8_64 = arith.constant 8 : index
    %c0_65 = arith.constant 0 : index
    %c0_66 = arith.constant 0 : index
    %96 = vector.load %arg6[%c0_63, %c8_64, %c0_65, %c0_66] : memref<1x9x8x8xf32, #tpu.memory_space<vmem>>, vector<1x1x8x8xf32>
    %97 = vector.shape_cast %96 : vector<1x1x8x8xf32> to vector<8x8xf32>
    %cst_67 = arith.constant dense<0.000000e+00> : vector<8x256xf32>
    %98 = tpu.matmul %97, %95, %cst_67 {dimension_numbers = #tpu.dot_dimension_numbers<[1], [0], [0], [1], [0, 0, 1, 1], [], []>} : vector<8x8xf32>, vector<8x256xf32>, vector<8x256xf32> -> vector<8x256xf32>
    %99 = arith.addf %91, %98 : vector<8x256xf32>
    %c0_68 = arith.constant 0 : index
    %c0_69 = arith.constant 0 : index
    %c0_70 = arith.constant 0 : index
    %100 = vector.load %arg7[%c0_68, %c0_69, %c0_70] : memref<1x8x1xf32, #tpu.memory_space<vmem>>, vector<1x8x1xf32>
    %101 = vector.shape_cast %100 : vector<1x8x1xf32> to vector<8x1xf32>
    %102 = vector.broadcast %101 : vector<8x1xf32> to vector<8x256xf32>
    %103 = arith.addf %99, %102 : vector<8x256xf32>
    %cst_71 = arith.constant dense<0.000000e+00> : vector<8xf32>
    %104 = vector.multi_reduction <add>, %103, %cst_71 [1] : vector<8x256xf32> to vector<8xf32>
    %105 = vector.shape_cast %104 : vector<8xf32> to vector<8x1xf32>
    %cst_72 = arith.constant 3.906250e-03 : f32
    %106 = vector.broadcast %cst_72 : f32 to vector<8x1xf32>
    %107 = arith.mulf %105, %106 : vector<8x1xf32>
    %108 = arith.mulf %103, %103 : vector<8x256xf32>
    %cst_73 = arith.constant dense<0.000000e+00> : vector<8xf32>
    %109 = vector.multi_reduction <add>, %108, %cst_73 [1] : vector<8x256xf32> to vector<8xf32>
    %110 = vector.shape_cast %109 : vector<8xf32> to vector<8x1xf32>
    %cst_74 = arith.constant 3.906250e-03 : f32
    %111 = vector.broadcast %cst_74 : f32 to vector<8x1xf32>
    %112 = arith.mulf %110, %111 : vector<8x1xf32>
    %113 = arith.mulf %107, %107 : vector<8x1xf32>
    %114 = arith.subf %112, %113 : vector<8x1xf32>
    %cst_75 = arith.constant 0.000000e+00 : f32
    %115 = vector.broadcast %cst_75 : f32 to vector<8x1xf32>
    %116 = arith.maximumf %114, %115 : vector<8x1xf32>
    %117 = vector.broadcast %107 : vector<8x1xf32> to vector<8x256xf32>
    %118 = arith.subf %103, %117 : vector<8x256xf32>
    %cst_76 = arith.constant 9.99999974E-6 : f32
    %119 = vector.broadcast %cst_76 : f32 to vector<8x1xf32>
    %120 = arith.addf %116, %119 : vector<8x1xf32>
    %121 = math.rsqrt %120 : vector<8x1xf32>
    %122 = vector.broadcast %121 : vector<8x1xf32> to vector<8x256xf32>
    %123 = arith.mulf %118, %122 : vector<8x256xf32>
    %cst_77 = arith.constant 0.000000e+00 : f32
    %124 = vector.broadcast %cst_77 : f32 to vector<8x256xf32>
    %125 = arith.maximumf %123, %124 : vector<8x256xf32>
    %c0_78 = arith.constant 0 : index
    %c0_79 = arith.constant 0 : index
    %c0_80 = arith.constant 0 : index
    %126 = vector.load %arg8[%c0_78, %c0_79, %c0_80] : memref<1x4x8xf32, #tpu.memory_space<vmem>>, vector<1x4x8xf32>
    %127 = vector.shape_cast %126 : vector<1x4x8xf32> to vector<4x8xf32>
    %cst_81 = arith.constant dense<0.000000e+00> : vector<4x256xf32>
    %128 = tpu.matmul %127, %125, %cst_81 {dimension_numbers = #tpu.dot_dimension_numbers<[1], [0], [0], [1], [0, 0, 1, 1], [], []>} : vector<4x8xf32>, vector<8x256xf32>, vector<4x256xf32> -> vector<4x256xf32>
    %c0_82 = arith.constant 0 : index
    %c0_83 = arith.constant 0 : index
    %c0_84 = arith.constant 0 : index
    %129 = vector.load %arg9[%c0_82, %c0_83, %c0_84] : memref<1x4x1xf32, #tpu.memory_space<vmem>>, vector<1x4x1xf32>
    %130 = vector.shape_cast %129 : vector<1x4x1xf32> to vector<4x1xf32>
    %131 = vector.broadcast %130 : vector<4x1xf32> to vector<4x256xf32>
    %132 = arith.addf %128, %131 : vector<4x256xf32>
    %cst_85 = arith.constant dense<0.000000e+00> : vector<4xf32>
    %133 = vector.multi_reduction <add>, %132, %cst_85 [1] : vector<4x256xf32> to vector<4xf32>
    %134 = vector.shape_cast %133 : vector<4xf32> to vector<4x1xf32>
    %cst_86 = arith.constant 3.906250e-03 : f32
    %135 = vector.broadcast %cst_86 : f32 to vector<4x1xf32>
    %136 = arith.mulf %134, %135 : vector<4x1xf32>
    %137 = arith.mulf %132, %132 : vector<4x256xf32>
    %cst_87 = arith.constant dense<0.000000e+00> : vector<4xf32>
    %138 = vector.multi_reduction <add>, %137, %cst_87 [1] : vector<4x256xf32> to vector<4xf32>
    %139 = vector.shape_cast %138 : vector<4xf32> to vector<4x1xf32>
    %cst_88 = arith.constant 3.906250e-03 : f32
    %140 = vector.broadcast %cst_88 : f32 to vector<4x1xf32>
    %141 = arith.mulf %139, %140 : vector<4x1xf32>
    %142 = arith.mulf %136, %136 : vector<4x1xf32>
    %143 = arith.subf %141, %142 : vector<4x1xf32>
    %cst_89 = arith.constant 0.000000e+00 : f32
    %144 = vector.broadcast %cst_89 : f32 to vector<4x1xf32>
    %145 = arith.maximumf %143, %144 : vector<4x1xf32>
    %146 = vector.broadcast %136 : vector<4x1xf32> to vector<4x256xf32>
    %147 = arith.subf %132, %146 : vector<4x256xf32>
    %cst_90 = arith.constant 9.99999974E-6 : f32
    %148 = vector.broadcast %cst_90 : f32 to vector<4x1xf32>
    %149 = arith.addf %145, %148 : vector<4x1xf32>
    %150 = math.rsqrt %149 : vector<4x1xf32>
    %151 = vector.broadcast %150 : vector<4x1xf32> to vector<4x256xf32>
    %152 = arith.mulf %147, %151 : vector<4x256xf32>
    %153 = arith.addf %3, %152 : vector<4x256xf32>
    %c0_91 = arith.constant 0 : index
    %c0_92 = arith.constant 0 : index
    %154 = vector.load %arg11[%c0_91, %c0_92] : memref<4x256xf32, #tpu.memory_space<vmem>>, vector<4x256xf32>
    tpu.vector_store %arg11[%c0_91, %c0_92], %153 {strides = array<i32>} : memref<4x256xf32, #tpu.memory_space<vmem>>, vector<4x256xf32>,
    %c1_i32_93 = arith.constant 1 : i32
    %155 = arith.cmpi eq, %arg1, %c1_i32_93 : i32
    %156 = arith.extui %155 : i1 to i32
    %c0_i32_94 = arith.constant 0 : i32
    %157 = arith.cmpi ne, %156, %c0_i32_94 : i32
    scf.if %157 {
      %c0_95 = arith.constant 0 : index
      %c0_96 = arith.constant 0 : index
      %c0_97 = arith.constant 0 : index
      %158 = vector.load %arg10[%c0_95, %c0_96, %c0_97] : memref<1x4x256xf32, #tpu.memory_space<vmem>>, vector<1x4x256xf32>
      %159 = vector.shape_cast %158 : vector<1x4x256xf32> to vector<4x256xf32>
      %160 = vector.shape_cast %153 : vector<4x256xf32> to vector<1x4x256xf32>
      tpu.vector_store %arg10[%c0_95, %c0_96, %c0_97], %160 {strides = array<i32>} : memref<1x4x256xf32, #tpu.memory_space<vmem>>, vector<1x4x256xf32>,
    } else {
    }
    return
  }
  func.func @transform_0(%arg0: i32, %arg1: i32) -> (i32, i32, i32) {
    %c0_i32 = arith.constant 0 : i32
    %c0_i32_0 = arith.constant 0 : i32
    %c0_i32_1 = arith.constant 0 : i32
    return %arg0, %c0_i32, %c0_i32_0 : i32, i32, i32
  }
  func.func @transform_1(%arg0: i32, %arg1: i32) -> (i32, i32) {
    %c0_i32 = arith.constant 0 : i32
    %c0_i32_0 = arith.constant 0 : i32
    %c0_i32_1 = arith.constant 0 : i32
    return %c0_i32, %c0_i32_0 : i32, i32
  }
  func.func @transform_2(%arg0: i32, %arg1: i32) -> (i32, i32, i32) {
    %c0_i32 = arith.constant 0 : i32
    %c0_i32_0 = arith.constant 0 : i32
    %c0_i32_1 = arith.constant 0 : i32
    return %arg1, %c0_i32, %c0_i32_0 : i32, i32, i32
  }
  func.func @transform_3(%arg0: i32, %arg1: i32) -> (i32, i32, i32) {
    %c0_i32 = arith.constant 0 : i32
    %c0_i32_0 = arith.constant 0 : i32
    %c0_i32_1 = arith.constant 0 : i32
    return %arg1, %c0_i32, %c0_i32_0 : i32, i32, i32
  }
  func.func @transform_4(%arg0: i32, %arg1: i32) -> (i32, i32, i32, i32) {
    %c0_i32 = arith.constant 0 : i32
    %c0_i32_0 = arith.constant 0 : i32
    %c0_i32_1 = arith.constant 0 : i32
    %c0_i32_2 = arith.constant 0 : i32
    return %arg1, %c0_i32, %c0_i32_0, %c0_i32_1 : i32, i32, i32, i32
  }
  func.func @transform_5(%arg0: i32, %arg1: i32) -> (i32, i32, i32) {
    %c0_i32 = arith.constant 0 : i32
    %c0_i32_0 = arith.constant 0 : i32
    %c0_i32_1 = arith.constant 0 : i32
    return %arg1, %c0_i32, %c0_i32_0 : i32, i32, i32
  }
  func.func @transform_6(%arg0: i32, %arg1: i32) -> (i32, i32, i32) {
    %c0_i32 = arith.constant 0 : i32
    %c0_i32_0 = arith.constant 0 : i32
    %c0_i32_1 = arith.constant 0 : i32
    return %arg1, %c0_i32, %c0_i32_0 : i32, i32, i32
  }
  func.func @transform_7(%arg0: i32, %arg1: i32) -> (i32, i32, i32) {
    %c0_i32 = arith.constant 0 : i32
    %c0_i32_0 = arith.constant 0 : i32
    %c0_i32_1 = arith.constant 0 : i32
    return %arg1, %c0_i32, %c0_i32_0 : i32, i32, i32
  }
  func.func @transform_8(%arg0: i32, %arg1: i32) -> (i32, i32, i32) {
    %c0_i32 = arith.constant 0 : i32
    %c0_i32_0 = arith.constant 0 : i32
    %c0_i32_1 = arith.constant 0 : i32
    return %arg0, %c0_i32, %c0_i32_0 : i32, i32, i32
  }
}

</mosaic_0001>

<bundles_post_ra>
// kernel: resblocks_pallas.1
= control target key start
LH: loop header
LB: loop body
LE: loop exit
PB: predicated region body
PF: predicated region fallthrough
CT: control target
= control target key end

     0   :  { %s1901_s27 = smov 0   ;;  %s1903_s28 = smov 0   ;;  %s2115_s0 = inlined_call_operand.vmem [shape: f32[2,4,256], index: 0, kind: input, shape index: {}, may-alias: {0,8}]   ;;  %s2116_s1 = inlined_call_operand.vmem [shape: f32[9,256], index: 1, kind: input, shape index: {}]   ;;  %s2117_s2 = inlined_call_operand.vmem [shape: f32[2,8,4], index: 2, kind: input, shape index: {}]   ;;  %s2118_s3 = inlined_call_operand.vmem [shape: f32[2,8,1], index: 3, kind: input, shape index: {}]   ;;  %s2119_s4 = inlined_call_operand.vmem [shape: f32[2,9,8,8], index: 4, kind: input, shape index: {}]   ;;  %s2120_s5 = inlined_call_operand.vmem [shape: f32[2,8,1], index: 5, kind: input, shape index: {}]   ;;  %s2121_s6 = inlined_call_operand.vmem [shape: f32[2,4,8], index: 6, kind: input, shape index: {}]   ;;  %s2122_s7 = inlined_call_operand.vmem [shape: f32[2,4,1], index: 7, kind: input, shape index: {}]   ;;  %s2123_s8 = inlined_call_operand.vmem [shape: f32[2,4,256], index: 8, kind: output, shape index: {}, may-alias: {0,8}]  }
   0x1   :  { %2125 = sst [smem:[#allocation6_spill]] %s2115_s0  ;;  %s1905_s29 = smov 0  }
   0x2   :  { %2126 = sst [smem:[#allocation7_spill]] %s2117_s2  ;;  %s1907_s30 = smov 0  }
   0x3   :  { %2127 = sst [smem:[#allocation8_spill]] %s2118_s3  ;;  %s1909_s9 = smov 0  }
   0x4 LB: > { %2128 = sst [smem:[#allocation3_spill]] %s1840_s30  ;;  %s27_s10 = sadd.s32 1, %s1836_s29  ;;  %s1844_s9 = sphi %s1909_s9, %s18_s9   ;;  %s1840_s30 = sphi %s1907_s30, %s2136_s30   ;;  %s1836_s29 = sphi %s1905_s29, %s2138_s29   ;;  %s1832_s28 = sphi %s1903_s28, %s2134_s28   ;;  %s1828_s27 = sphi %s1901_s27, %s2137_s27  }
   0x5   : > { %s30_s11 = sadd.s32 1, %s1840_s30  ;;  %p28_p0 = scmp.ge.s32.totalorder %s27_s10, 2 }
   0x6   : > { %p1701_p1 = scmp.ge.s32.totalorder %s1844_s9, 1  ;;  %p329_p2 = scmp.lt.s32.totalorder %s1844_s9, 5 }
   0x7   : > { %s2140_s10 = smov (%p28_p0, %s27_s10), 0  ;;  %s2142_s11 = smov (!%p28_p0, %s30_s11), %s1840_s30 }
   0x8   : > { %2129 = sst [smem:[#allocation4_spill]] %s2140_s10  ;;  %p330_p3 = pnand %p1701_p1, %p329_p2 }
   0x9   : > { %p32_p4 = scmp.ge.s32.totalorder %s2142_s11, 2  ;;  %p388_p5 = scmp.lt.s32.totalorder (!%p330_p3), %s1832_s28, 1 }
   0xa   : > { %333 = sbr.rel (%p330_p3) target bundleno = 1311 (0x51f), region = 52  ;;  %p393_p6 = scmp.lt.s32.totalorder (!%p330_p3), %s1828_s27, 1 }
   0xb   : > { %s2144_s11 = smov (%p32_p4, %s2142_s11), 0  ;;  %s2131_s0 = sld [smem:[#allocation6_spill]] (!%p330_p3) }
   0xc   : > { %2130 = sst [smem:[#allocation5_spill]] %s2144_s11  ;;  %p1712_p7 = scmp.ne.s32.totalorder (!%p330_p3), %s1828_s27, 0 }
   0xd   : > { %s2132_s2 = sld [smem:[#allocation7_spill]] (!%p330_p3) }
   0xe   : > { %s2133_s3 = sld [smem:[#allocation8_spill]] (!%p330_p3) }
   0xf   : > { %s2146_s28 = smov (!%p388_p5, %s1832_s28), 1 }
  0x10   : > { %s394_s12 = scalar_select %p393_p6, %s1828_s27, 1 }
  0x11   : > { %s1744_s13 = sshll.u32 %s2146_s28, 3 }
  0x12   : > { %s392_s16 = scalar_lea.vmem %s2131_s0, %s1744_s13  ;;  %s1938_s17 = sshll.u32 %s394_s12, 3 }
  0x13   : > { %s396_s20 = scalar_lea.vmem %s2132_s2, %s1938_s17  ;;  %s1746_s24 = smul.u32 72, %s394_s12 }
  0x14   : > { %s400_s23 = scalar_lea.vmem %s2133_s3, %s1938_s17  ;;  %s409_s28 = scalar_lea.vmem %s2120_s5, %s1938_s17 }
  0x15   : > { %s1708_s14 = sshll.u32 %s394_s12, 2  ;;  %s1955_s11 = scalar_lea.vmem %s2123_s8, %s1744_s13 }
  0x16   : > { %s1960_s19 = scalar_lea.vmem %s2119_s4, %s1746_s24  ;;  %s1965_s21 = scalar_lea.vmem %s2121_s6, %s1708_s14 }
  0x17   : > { %s1970_s25 = scalar_lea.vmem %s2122_s7, %s1708_s14  ;;  %426 = sbr.rel (%p1712_p7) target bundleno = 30 (0x1e), region = 56 }
  0x1c   : > { %v427_v0 = vld [vmem:[%s392_s16] sm:$0xff] }
  0x1d   : > { %428 = vst [vmem:[#allocation2] sm:$0xff] %v427_v0 }
  0x1e PF: > { %vm443_vm0 = vcmask 1043456   ;;  %v1846_v3 = vmov 0.0   ;;  %v1847_v4 = vmov 0   ;;  %v431_v5 = vld [vmem:[%s400_s23] sm:$0xff]  ;;  %vm439_vm1 = vcmask 31744   ;;  %s1848_s0 = smov 15  }
  0x1f   : > { %512 = vmatprep.mubr.f32.mxu0 %v1846_v3  ;;  %1797 = vset.pattern.permute.xlu0 %v1847_v4  ;;  %v430_v6 = vld [vmem:[%s396_s20] sm:$0xff]  ;;  %s1849_s2 = smov 16   ;;  %s1850_s3 = smov 113   ;;  %v544_v32 = vlaneseq  ;;  %v1717_v47 = vld [vmem:[%s1960_s19 + $0x8] sm:$0xff]  ;;  %vm588_vm3 = vcmask 64512  }
  0x20   : > { %434 = vperm.xlu0 %1797, %v431_v5   ;;  %656 = vmatprep.mubr.f32.mxu1 %v1846_v3  ;;  %s1851_s30 = smov 112   ;;  %s1852_s10 = smov 17   ;;  %v1415_v31 = vld [vmem:[%s409_s28] sm:$0xff] }
  0x21   : > { %1798 = vset.pattern.permute.xlu1 %v1847_v4  ;;  %s1853_s12 = smov 111   ;;  %s1854_s13 = smov 1   ;;  %v552_v33 = vshrl.u32 %v544_v32, 7  ;;  %v2008_v34 = vand.u32 127, %v544_v32  ;;  %v563_v59 = vld [vmem:[%s1960_s19] sm:$0xff]  ;;  %v1721_v4 = vld [vmem:[%s1960_s19 + $0x10] sm:$0xff] }
  0x22   : > { %s1855_s16 = smov 127   ;;  %v1716_v37 = vld [vmem:[%s2116_s1 + $0x1] ss:$8 sm:$0x3]  ;;  %p1741_p8 = scmp.ne.s32.totalorder %s1828_s27, 1 }
  0x23   : > { %v2010_v35 = vsub.s32 1, %v552_v33  ;;  %v2012_v36 = vsub.s32 0, %v552_v33  ;;  %vm568_vm2 = vcmp.lt.s32.totalorder %v2008_v34, 16  ;;  %v549_v46 = vld [vmem:[%s2116_s1] ss:$8 sm:$0x3] }
  0x24   : > { %v1973_v1 = vld [vmem:[#allocation2] sm:$0xff]  ;;  %vm546_vm4 = vcmp.lt.s32.totalorder %v2008_v34, 17  ;;  %vm741_vm5 = vcmp.lt.s32.totalorder %v2008_v34, 15  ;;  %vm841_vm6 = vcmp.lt.s32.totalorder %v2008_v34, 1  ;;  %vm1019_vm7 = vcmp.lt.s32.totalorder %v2008_v34, 127 }
  0x25   : > { %v438_v2 = vcombine.high %v1973_v1, %v1973_v1  ;;  %v581_v39 = vrot.slane %v1716_v37, %v2010_v35  ;;  %v577_v40 = vrot.slane %v1716_v37, %v2012_v36  ;;  %v554_v49 = vrot.slane %v549_v46, %v2012_v36  ;;  %v1720_v51 = vld [vmem:[%s2116_s1 + $0x2] ss:$8 sm:$0x3]  ;;  %v1723_v5 = vld [vmem:[%s2116_s1 + $0x3] ss:$8 sm:$0x3] }
  0x26   : > { %v558_v50 = vrot.slane %v549_v46, %v2010_v35  ;;  %v750_v57 = vrot.slane %v1720_v51, %v2012_v36  ;;  %v754_v58 = vrot.slane %v1720_v51, %v2010_v35  ;;  %vm1119_vm8 = vcmp.lt.s32.totalorder %v2008_v34, 113  ;;  %v1735_v51 = vld [vmem:[%s1960_s19 + $0x38] sm:$0xff] }
  0x27   : > { %1713 = vmatprep.subr.msk.mxu0 %vm443_vm0, %v438_v2  ;;  %vm1219_vm9 = vcmp.lt.s32.totalorder %v2008_v34, 112  ;;  %vm1319_vm10 = vcmp.lt.s32.totalorder %v2008_v34, 111 }
  0x28   : > { %1714 = vmatpush1.msk.msra.mxu0 %vm443_vm0, %v1973_v1 }
  0x29   : > { %1715 = vmatmul.mubr.msk.f32.vlgmr.msra.gmra.mxu0 %vm439_vm1, %v430_v6 }
  0x2a   : > { %730 = vmatprep.mubr.f32.mxu0 %v1846_v3 }
  0x9b   : > { %v435_v7 = vpop.permute.xlu0 %434 }
  0xe9   : > { %v514_v8 = vpop.f32.mrf.mxu0 }
  0xea   : > { %v515_v9 = vadd.f32 %v514_v8, %v435_v7  ;;  %v854_v8 = vrot.slane %v1723_v5, %v2010_v35 }
  0xeb   : > { %v516_v10 = vpop.f32.mrf.mxu0 }
  0xec   : > { %v517_v11 = vadd.f32 %v516_v10, %v435_v7  ;;  %v523_v13 = vmul.f32 %v515_v9, %v515_v9  ;;  %v850_v7 = vrot.slane %v1723_v5, %v2012_v36 }
  0xee   : > { %v519_v12 = vadd.f32 %v517_v11, %v515_v9  ;;  %v524_v14 = vmul.f32 %v517_v11, %v517_v11 }
  0xf0   : > { %520 = vadd.xlane.f32.xlu0 %v519_v12  ;;  %v525_v15 = vadd.f32 %v524_v14, %v523_v13 }
  0xf2   : > { %526 = vadd.xlane.f32.xlu1 %v525_v15  ;;  %v1728_v15 = vld [vmem:[%s2116_s1 + $0x5] ss:$8 sm:$0x3] }
 0x179   : > { %v521_v16 = vpop.xlane.xlu0 %520 }
 0x17a   : > { %v522_v17 = vmul.f32 0.00390625, %v521_v16  ;;  %v1724_v16 = vld [vmem:[%s1960_s19 + $0x18] sm:$0xff] }
 0x17b   : > { %v527_v18 = vpop.xlane.xlu1 %526 }
 0x17c   : > { %v528_v19 = vmul.f32 0.00390625, %v527_v18  ;;  %v529_v20 = vmul.f32 %v522_v17, %v522_v17  ;;  %v532_v24 = vsub.f32 %v515_v9, %v522_v17  ;;  %v533_v25 = vsub.f32 %v517_v11, %v522_v17  ;;  %v1726_v9 = vld [vmem:[%s1960_s19 + $0x20] sm:$0xff] }
 0x17d   : > { %v1028_v18 = vrot.slane %v1728_v15, %v2012_v36 }
 0x17e   : > { %v530_v21 = vsub.f32 %v528_v19, %v529_v20  ;;  %v1032_v19 = vrot.slane %v1728_v15, %v2010_v35  ;;  %v1731_v20 = vld [vmem:[%s2116_s1 + $0x6] ss:$8 sm:$0x3] }
 0x180   : > { %v531_v22 = vmax.f32 %v530_v21, 0.0 }
 0x182   : > { %v534_v23 = vadd.f32 1e-05, %v531_v22 }
 0x184   : > { %1800 = vrsqrt.f32 %v534_v23 }
 0x191   : > { %v1801_v26 = vpop.eup %1800 }
 0x192   : > { %v536_v27 = vmul.f32 %v1801_v26, %v532_v24  ;;  %v537_v28 = vmul.f32 %v1801_v26, %v533_v25 }
 0x194   : > { %v1983_v29 = vmax.f32 %v536_v27, 0.0  ;;  %v1985_v30 = vmax.f32 %v537_v28, 0.0  ;;  %v1128_v27 = vrot.slane %v1731_v20, %v2012_v36  ;;  %v1132_v28 = vrot.slane %v1731_v20, %v2010_v35 }
 0x196   : > { %739 = vrot.lane.b32.xlu0 %v1985_v30, %s1848_s0  ;;  %564 = vrot.lane.b32.xlu1 %v1983_v29, %s1849_s2 }
 0x19a   : > { %1117 = vrot.lane.b32.xlu0 %v1985_v30, %s1850_s3  ;;  %566 = vrot.lane.b32.xlu1 %v1985_v30, %s1849_s2 }
 0x19e   : > { %1217 = vrot.lane.b32.xlu0 %v1985_v30, %s1851_s30  ;;  %540 = vrot.lane.b32.xlu1 %v1983_v29, %s1852_s10 }
 0x1a2   : > { %1317 = vrot.lane.b32.xlu0 %v1985_v30, %s1853_s12  ;;  %542 = vrot.lane.b32.xlu1 %v1985_v30, %s1852_s10 }
 0x1a6   : > { %737 = vrot.lane.b32.xlu1 %v1983_v29, %s1848_s0 }
 0x1aa   : > { %837 = vrot.lane.b32.xlu1 %v1983_v29, %s1854_s13 }
 0x1ae   : > { %839 = vrot.lane.b32.xlu1 %v1985_v30, %s1854_s13 }
 0x1b2   : > { %1015 = vrot.lane.b32.xlu1 %v1983_v29, %s1855_s16 }
 0x1b6   : > { %1017 = vrot.lane.b32.xlu1 %v1985_v30, %s1855_s16 }
 0x1ba   : > { %1115 = vrot.lane.b32.xlu1 %v1983_v29, %s1850_s3 }
 0x1be   : > { %1215 = vrot.lane.b32.xlu1 %v1983_v29, %s1851_s30 }
 0x1c2   : > { %1315 = vrot.lane.b32.xlu1 %v1983_v29, %s1853_s12 }
 0x1c6   : > { %1418 = vperm.xlu1 %1798, %v1415_v31  }
 0x208   : > { %v565_v38 = vpop.permute.xlu1 %564  ;;  %v740_v60 = vpop.permute.xlu0 %739 }
 0x20c   : > { %v567_v41 = vpop.permute.xlu1 %566  ;;  %v1118_v21 = vpop.permute.xlu0 %1117 }
 0x20d   : > { %v570_v42 = vsel %vm568_vm2, %v567_v41, %v565_v38  ;;  %v569_v43 = vsel %vm568_vm2, %v565_v38, %v567_v41 }
 0x20e   : > { %v585_v44 = vmul.f32 %v581_v39, %v569_v43  ;;  %v584_v45 = vmul.f32 %v577_v40, %v570_v42  ;;  %v1732_v42 = vld [vmem:[%s1960_s19 + $0x30] sm:$0xff] }
 0x20f   : > { %v1737_v43 = vld [vmem:[%s2116_s1 + $0x10] ss:$8 sm:$0x3] }
 0x210   : > { %622 = vmatprep.subr.mxu1 %v585_v44  ;;  %v541_v48 = vpop.permute.xlu1 %540  ;;  %v1218_v37 = vpop.permute.xlu0 %1217 }
 0x211   : > { %623 = vmatpush1.msra.mxu1 %v584_v45 }
 0x212   : > { %1718 = vmatmul.mubr.msk.f32.vlgmr.msra.gmra.mxu1 %vm588_vm3, %v1717_v47 }
 0x213   : > { %828 = vmatprep.mubr.f32.mxu1 %v1846_v3 }
 0x214   : > { %v543_v52 = vpop.permute.xlu1 %542 }
 0x215   : > { %v547_v53 = vsel %vm546_vm4, %v541_v48, %v543_v52  ;;  %v548_v54 = vsel %vm546_vm4, %v543_v52, %v541_v48  ;;  %v1318_v52 = vpop.permute.xlu0 %1317 }
 0x216   : > { %v561_v55 = vmul.f32 %v554_v49, %v548_v54  ;;  %v562_v56 = vmul.f32 %v558_v50, %v547_v53  ;;  %v1328_v49 = vrot.slane %v1737_v43, %v2012_v36  ;;  %v1332_v50 = vrot.slane %v1737_v43, %v2010_v35 }
 0x218   : > { %696 = vmatprep.subr.mxu0 %v562_v56  ;;  %v738_v61 = vpop.permute.xlu1 %737 }
 0x219   : > { %v742_v62 = vsel %vm741_vm5, %v738_v61, %v740_v60  ;;  %v743_v63 = vsel %vm741_vm5, %v740_v60, %v738_v61  ;;  %697 = vmatpush1.msra.mxu0 %v561_v55 }
 0x21a   : > { %v757_v0 = vmul.f32 %v750_v57, %v743_v63  ;;  %v758_v2 = vmul.f32 %v754_v58, %v742_v62  ;;  %1719 = vmatmul.mubr.msk.f32.vlgmr.msra.gmra.mxu0 %vm588_vm3, %v563_v59  ;;  %v1738_v57 = vld [vmem:[%s1960_s19 + $0x40] sm:$0xff] }
 0x21b   : > { %928 = vmatprep.mubr.f32.mxu0 %v1846_v3 }
 0x21c   : > { %794 = vmatprep.subr.mxu1 %v758_v2  ;;  %v838_v6 = vpop.permute.xlu1 %837 }
 0x21d   : > { %795 = vmatpush1.msra.mxu1 %v757_v0 }
 0x21e   : > { %972 = vmatprep.subr.mxu1 %v1985_v30  ;;  %1722 = vmatmul.mubr.msk.f32.vlgmr.msra.gmra.mxu1 %vm588_vm3, %v1721_v4  ;;  %v1734_v30 = vld [vmem:[%s2116_s1 + $0x7] ss:$8 sm:$0x3] }
 0x21f   : > { %973 = vmatpush1.msra.mxu1 %v1983_v29  ;;  %1006 = vmatprep.mubr.f32.mxu1 %v1846_v3  ;;  %v1729_v29 = vld [vmem:[%s1960_s19 + $0x28] sm:$0xff]  ;;  %v1228_v40 = vrot.slane %v1734_v30, %v2012_v36  ;;  %v1232_v41 = vrot.slane %v1734_v30, %v2010_v35 }
 0x220   : > { %v840_v10 = vpop.permute.xlu1 %839 }
 0x221   : > { %v842_v11 = vsel %vm841_vm6, %v838_v6, %v840_v10  ;;  %v843_v12 = vsel %vm841_vm6, %v840_v10, %v838_v6 }
 0x222   : > { %v857_v13 = vmul.f32 %v850_v7, %v843_v12  ;;  %v858_v14 = vmul.f32 %v854_v8, %v842_v11  ;;  %1727 = vmatmul.mubr.msk.f32.vlgmr.msra.gmra.mxu1 %vm588_vm3, %v1726_v9 }
 0x223   : > { %1206 = vmatprep.mubr.f32.mxu1 %v1846_v3 }
 0x224   : > { %894 = vmatprep.subr.mxu0 %v858_v14  ;;  %v1016_v17 = vpop.permute.xlu1 %1015 }
 0x225   : > { %895 = vmatpush1.msra.mxu0 %v857_v13 }
 0x226   : > { %1725 = vmatmul.mubr.msk.f32.vlgmr.msra.gmra.mxu0 %vm588_vm3, %v1724_v16 }
 0x227   : > { %1106 = vmatprep.mubr.f32.mxu0 %v1846_v3 }
 0x228   : > { %v1018_v22 = vpop.permute.xlu1 %1017 }
 0x229   : > { %v1020_v23 = vsel %vm1019_vm7, %v1016_v17, %v1018_v22  ;;  %v1021_v24 = vsel %vm1019_vm7, %v1018_v22, %v1016_v17 }
 0x22a   : > { %v1035_v25 = vmul.f32 %v1028_v18, %v1020_v23  ;;  %v1036_v26 = vmul.f32 %v1032_v19, %v1021_v24 }
 0x22c   : > { %1072 = vmatprep.subr.mxu0 %v1036_v26  ;;  %v1116_v31 = vpop.permute.xlu1 %1115 }
 0x22d   : > { %v1120_v32 = vsel %vm1119_vm8, %v1116_v31, %v1118_v21  ;;  %v1121_v33 = vsel %vm1119_vm8, %v1118_v21, %v1116_v31  ;;  %1073 = vmatpush1.msra.mxu0 %v1035_v25 }
 0x22e   : > { %v1135_v38 = vmul.f32 %v1128_v27, %v1120_v32  ;;  %v1136_v39 = vmul.f32 %v1132_v28, %v1121_v33  ;;  %1730 = vmatmul.mubr.msk.f32.vlgmr.msra.gmra.mxu0 %vm588_vm3, %v1729_v29 }
 0x22f   : > { %1306 = vmatprep.mubr.f32.mxu0 %v1846_v3 }
 0x230   : > { %1172 = vmatprep.subr.mxu1 %v1136_v39  ;;  %v1216_v44 = vpop.permute.xlu1 %1215 }
 0x231   : > { %v1220_v45 = vsel %vm1219_vm9, %v1216_v44, %v1218_v37  ;;  %v1221_v46 = vsel %vm1219_vm9, %v1218_v37, %v1216_v44  ;;  %1173 = vmatpush1.msra.mxu1 %v1135_v38  ;;  %v1445_v37 = vld [vmem:[%s1970_s25] sm:$0xf] }
 0x232   : > { %v1235_v47 = vmul.f32 %v1228_v40, %v1220_v45  ;;  %v1236_v48 = vmul.f32 %v1232_v41, %v1221_v46  ;;  %1733 = vmatmul.mubr.msk.f32.vlgmr.msra.gmra.mxu1 %vm588_vm3, %v1732_v42 }
 0x233   : > { %1406 = vmatprep.mubr.f32.mxu1 %v1846_v3 }
 0x234   : > { %1272 = vmatprep.subr.mxu0 %v1236_v48  ;;  %v1316_v53 = vpop.permute.xlu1 %1315 }
 0x235   : > { %v1320_v54 = vsel %vm1319_vm10, %v1316_v53, %v1318_v52  ;;  %v1321_v55 = vsel %vm1319_vm10, %v1318_v52, %v1316_v53  ;;  %1273 = vmatpush1.msra.mxu0 %v1235_v47  ;;  %v1444_v53 = vld [vmem:[%s1965_s21] sm:$0xf] }
 0x236   : > { %v1335_v56 = vmul.f32 %v1328_v49, %v1320_v54  ;;  %v1336_v34 = vmul.f32 %v1332_v50, %v1321_v55  ;;  %1736 = vmatmul.mubr.msk.f32.vlgmr.msra.gmra.mxu0 %vm588_vm3, %v1735_v51 }
 0x237   : > { %1518 = vmatprep.mubr.f32.mxu0 %v1846_v3 }
 0x238   : > { %1372 = vmatprep.subr.mxu1 %v1336_v34 }
 0x239   : > { %1373 = vmatpush1.msra.mxu1 %v1335_v56 }
 0x23a   : > { %1739 = vmatmul.mubr.msk.f32.vlgmr.msra.gmra.mxu1 %vm588_vm3, %v1738_v57 }
 0x241   : > { %v1419_v23 = vpop.permute.xlu1 %1418 }
 0x2d2   : > { %v658_v35 = vpop.f32.mrf.mxu1 }
 0x2d4   : > { %v660_v36 = vpop.f32.mrf.mxu1 }
 0x2da   : > { %v732_v58 = vpop.f32.mrf.mxu0 }
 0x2db   : > { %v733_v59 = vadd.f32 %v732_v58, %v658_v35 }
 0x2dc   : > { %v734_v60 = vpop.f32.mrf.mxu0 }
 0x2dd   : > { %v735_v62 = vadd.f32 %v734_v60, %v660_v36 }
 0x2de   : > { %v830_v61 = vpop.f32.mrf.mxu1 }
 0x2df   : > { %v835_v63 = vadd.f32 %v830_v61, %v733_v59 }
 0x2e0   : > { %v832_v0 = vpop.f32.mrf.mxu1 }
 0x2e1   : > { %v836_v4 = vadd.f32 %v832_v0, %v735_v62 }
 0x2e2   : > { %v1008_v7 = vpop.f32.mrf.mxu1 }
 0x2e4   : > { %v1010_v9 = vpop.f32.mrf.mxu1 }
 0x2e6   : > { %v930_v2 = vpop.f32.mrf.mxu0 }
 0x2e7   : > { %v935_v5 = vadd.f32 %v930_v2, %v835_v63 }
 0x2e8   : > { %v932_v6 = vpop.f32.mrf.mxu0 }
 0x2e9   : > { %v936_v8 = vadd.f32 %v932_v6, %v836_v4  ;;  %v1013_v3 = vadd.f32 %v1008_v7, %v935_v5 }
 0x2eb   : > { %v1014_v11 = vadd.f32 %v1010_v9, %v936_v8 }
 0x2ee   : > { %v1108_v10 = vpop.f32.mrf.mxu0 }
 0x2ef   : > { %v1113_v12 = vadd.f32 %v1108_v10, %v1013_v3 }
 0x2f0   : > { %v1110_v13 = vpop.f32.mrf.mxu0 }
 0x2f1   : > { %v1114_v15 = vadd.f32 %v1110_v13, %v1014_v11 }
 0x2f2   : > { %v1208_v14 = vpop.f32.mrf.mxu1 }
 0x2f3   : > { %v1213_v16 = vadd.f32 %v1208_v14, %v1113_v12 }
 0x2f4   : > { %v1210_v17 = vpop.f32.mrf.mxu1 }
 0x2f5   : > { %v1214_v20 = vadd.f32 %v1210_v17, %v1114_v15 }
 0x2f6   : > { %v1308_v18 = vpop.f32.mrf.mxu0 }
 0x2f7   : > { %v1313_v21 = vadd.f32 %v1308_v18, %v1213_v16 }
 0x2f8   : > { %v1310_v19 = vpop.f32.mrf.mxu0 }
 0x2f9   : > { %v1314_v24 = vadd.f32 %v1310_v19, %v1214_v20 }
 0x2fa   : > { %v1408_v22 = vpop.f32.mrf.mxu1 }
 0x2fb   : > { %v1413_v25 = vadd.f32 %v1408_v22, %v1313_v21 }
 0x2fc   : > { %v1410_v26 = vpop.f32.mrf.mxu1 }
 0x2fd   : > { %v1414_v27 = vadd.f32 %v1410_v26, %v1314_v24  ;;  %v1421_v28 = vadd.f32 %v1419_v23, %v1413_v25 }
 0x2ff   : > { %v1422_v29 = vadd.f32 %v1419_v23, %v1414_v27  ;;  %v1427_v31 = vmul.f32 %v1421_v28, %v1421_v28 }
 0x301   : > { %v1423_v30 = vadd.f32 %v1422_v29, %v1421_v28  ;;  %v1428_v32 = vmul.f32 %v1422_v29, %v1422_v29 }
 0x303   : > { %1424 = vadd.xlane.f32.xlu0 %v1423_v30  ;;  %v1429_v33 = vadd.f32 %v1428_v32, %v1427_v31 }
 0x305   : > { %1430 = vadd.xlane.f32.xlu1 %v1429_v33 }
 0x319   : > { %1448 = vperm.xlu0 %1797, %v1445_v37  }
 0x38c   : > { %v1425_v38 = vpop.xlane.xlu0 %1424 }
 0x38d   : > { %v1426_v39 = vmul.f32 0.00390625, %v1425_v38 }
 0x38e   : > { %v1431_v40 = vpop.xlane.xlu1 %1430 }
 0x38f   : > { %v1432_v41 = vmul.f32 0.00390625, %v1431_v40  ;;  %v1433_v42 = vmul.f32 %v1426_v39, %v1426_v39  ;;  %v1436_v46 = vsub.f32 %v1421_v28, %v1426_v39  ;;  %v1437_v47 = vsub.f32 %v1422_v29, %v1426_v39 }
 0x391   : > { %v1434_v43 = vsub.f32 %v1432_v41, %v1433_v42 }
 0x393   : > { %v1435_v44 = vmax.f32 %v1434_v43, 0.0 }
 0x394   : > { %v1449_v54 = vpop.permute.xlu0 %1448 }
 0x395   : > { %v1438_v45 = vadd.f32 1e-05, %v1435_v44 }
 0x397   : > { %1802 = vrsqrt.f32 %v1438_v45 }
 0x3a4   : > { %v1803_v48 = vpop.eup %1802 }
 0x3a5   : > { %v1441_v49 = vmul.f32 %v1803_v48, %v1437_v47  ;;  %v1440_v50 = vmul.f32 %v1803_v48, %v1436_v46 }
 0x3a7   : > { %v1443_v51 = vmax.f32 %v1441_v49, 0.0  ;;  %v1442_v52 = vmax.f32 %v1440_v50, 0.0 }
 0x3a9   : > { %1484 = vmatprep.subr.mxu0 %v1443_v51 }
 0x3aa   : > { %1485 = vmatpush1.msra.mxu0 %v1442_v52 }
 0x3ab   : > { %1740 = vmatmul.mubr.msk.f32.vlgmr.msra.gmra.mxu0 %vm588_vm3, %v1444_v53 }
 0x46b   : > { %v1520_v55 = vpop.f32.mrf.mxu0 }
 0x46c   : > { %v1521_v56 = vadd.f32 %v1520_v55, %v1449_v54 }
 0x46d   : > { %v1522_v34 = vpop.f32.mrf.mxu0 }
 0x46e   : > { %v1523_v57 = vadd.f32 %v1522_v34, %v1449_v54  ;;  %v1525_v35 = vsel %vm443_vm0, %v1521_v56, 0.0  ;;  %v1531_v58 = vmul.f32 %v1521_v56, %v1521_v56 }
 0x470   : > { %v1526_v36 = vsel %vm443_vm0, %v1523_v57, 0.0  ;;  %v1532_v59 = vmul.f32 %v1523_v57, %v1523_v57  ;;  %v1533_v62 = vsel %vm443_vm0, %v1531_v58, 0.0 }
 0x471   : > { %v1527_v60 = vadd.f32 %v1526_v36, %v1525_v35 }
 0x472   : > { %v1534_v61 = vsel %vm443_vm0, %v1532_v59, 0.0 }
 0x473   : > { %1528 = vadd.xlane.f32.xlu1 %v1527_v60  ;;  %v1535_v63 = vadd.f32 %v1534_v61, %v1533_v62 }
 0x477   : > { %1536 = vadd.xlane.f32.xlu1 %v1535_v63 }
 0x4fc   : > { %v1529_v0 = vpop.xlane.xlu1 %1528 }
 0x4fd   : > { %v1530_v2 = vmul.f32 0.00390625, %v1529_v0 }
 0x4ff   : > { %v1539_v5 = vmul.f32 %v1530_v2, %v1530_v2  ;;  %v1542_v9 = vsub.f32 %v1521_v56, %v1530_v2  ;;  %v1543_v10 = vsub.f32 %v1523_v57, %v1530_v2 }
 0x500   : > { %v1537_v4 = vpop.xlane.xlu1 %1536 }
 0x501   : > { %v1538_v6 = vmul.f32 0.00390625, %v1537_v4 }
 0x503   : > { %v1540_v7 = vsub.f32 %v1538_v6, %v1539_v5 }
 0x505   : > { %v1541_v8 = vmax.f32 %v1540_v7, 0.0 }
 0x507   : > { %v1544_v3 = vadd.f32 1e-05, %v1541_v8 }
 0x509   : > { %1804 = vrsqrt.f32 %v1544_v3 }
 0x516   : > { %v1805_v11 = vpop.eup %1804 }
 0x517   : > { %v1546_v12 = vmul.f32 %v1805_v11, %v1542_v9  ;;  %v1547_v13 = vmul.f32 %v1805_v11, %v1543_v10 }
 0x519   : > { %v1550_v14 = vcombine.low %v1546_v12, %v1547_v13  ;;  %1557 = sbr.rel (%p1741_p8) target bundleno = 1311 (0x51f), region = 60 }
 0x51b   : > { %v1552_v15 = vadd.f32 %v1550_v14, %v1973_v1 }
 0x51d   : > { %1553 = vst [vmem:[#allocation2] sm:$0xff] %v1552_v15 }
 0x51e   : > { %1558 = vst [vmem:[%s1955_s11] sm:$0xff] %v1552_v15 }
 0x51f PF: > { %s18_s9 = sadd.s32 1, %s1844_s9   ;;  %s2134_s28 = sld [smem:[#allocation3_spill]] }
 0x520   : > { %p15_p9 = scmp.ge.s32.totalorder %s18_s9, 6   ;;  %s2135_s19 = sld [smem:[#allocation4_spill]] }
 0x521   : > { %s2136_s30 = sld [smem:[#allocation5_spill]]  ;;  %s2137_s27 = smov %s1836_s29 }
 0x522   :  { %17 = sbr.rel (!%p15_p9) target bundleno = 4 (0x4), region = 123 }
 0x526   : > { %s2138_s29 = smov %s2135_s19 }

</bundles_post_ra>
